<compile_context>
chip_gen: v5e
topology: v5e:2x2
jax: 0.10.0
libtpu: 0.0.40
codegen_flags: <defaults>
</compile_context>

<pallas_src>
import functools

import jax
import jax.numpy as jnp
import numpy as np
from jax.experimental import pallas as pl
from jax.experimental.pallas import tpu as pltpu

_VMEM_LIMIT = 32 * 1024 * 1024  # conservative scoped-VMEM budget (fits v5e/v6e/v7x)


# ----------------------------------------------------------------------------- tiling

def _pick_row_tile(H):
    """Largest row tile <= 128 that divides H (whole image if H <= 128)."""
    if H <= 128:
        return H
    for t in range(128, 7, -8):
        if H % t == 0:
            return t
    # TODO(synk): H > 128 with no multiple-of-8 divisor <= 128 falls back to one
    # register-heavy tile; a masked edge tile would be needed to do better.
    return H


# ----------------------------------------------------------------------------- kernels

def _conv_tile(x_ref, band_ref, row0, *, TH, TS, K):
    """3x3 conv for TH output rows: K full-slab MXU matmuls, f32 accumulation.

    One aligned (TS, W*Cin) slab load; vertical taps combined by statically sliced
    f32 matmul outputs (cheap in-register sublane shifts, no unaligned VMEM loads).
    """
    slab = x_ref[pl.ds(row0, TS), :]                       # (TS, W*Cin)
    ys = [jnp.dot(slab, band_ref[kh], preferred_element_type=jnp.float32)
          for kh in range(K)]                              # K x (TS, W*Cout)
    acc = ys[0][0:TH]
    for kh in range(1, K):
        acc = acc + ys[kh][kh:kh + TH]
    return acc                                             # (TH, W*Cout) f32


def _stats_kernel(x_ref, band_ref, part_ref, *, TH, TS, K):
    """Pass 1 (only when BN is enabled): per-tile [channel_sum; channel_sum_sq]."""
    r = pl.program_id(1)
    row0 = r * TH
    if TH % 8 == 0:
        row0 = pl.multiple_of(row0, 8)
    acc = _conv_tile(x_ref, band_ref, row0, TH=TH, TS=TS, K=K)
    ch_sum = jnp.sum(acc, axis=0, keepdims=True)           # (1, W*Cout)  XLU reduce
    ch_ssq = jnp.sum(acc * acc, axis=0, keepdims=True)     # (1, W*Cout)
    part_ref[...] = jnp.concatenate([ch_sum, ch_ssq], axis=0)   # lane-dense (2, W*Cout)


def _conv_bn_act_kernel(x_ref, band_ref, scale_ref, shift_ref, o_ref, *,
                        TH, TS, K, neg_slope):
    """Pass 2: recompute conv, apply per-channel scale/shift, LeakyReLU, write output."""
    r = pl.program_id(1)
    row0 = r * TH
    if TH % 8 == 0:
        row0 = pl.multiple_of(row0, 8)
    acc = _conv_tile(x_ref, band_ref, row0, TH=TH, TS=TS, K=K)
    y = acc * scale_ref[...] + shift_ref[...]              # (TH, W*Cout) * (1, W*Cout)
    o_ref[...] = jnp.where(y > 0, y, neg_slope * y).astype(o_ref.dtype)


# ----------------------------------------------------------------------------- weights

def _build_band_weights(weight_oihw, W, pad, dtype):
    """Lower the conv weight to K band matrices band[kh, w_in*Cin+ci, w_out*Cout+co].

    Horizontal SAME padding is folded into the (zeroed) off-band entries, so only a
    1-row vertical halo has to be materialized on the input.
    """
    Cout, Cin, K, _ = weight_oihw.shape
    w_hwio = jnp.transpose(weight_oihw, (2, 3, 1, 0)).astype(jnp.float32)  # (K,K,Cin,Cout)

    wi = np.arange(W)
    kw = wi[:, None] - wi[None, :] + pad                   # (W_in, W_out) tap index
    valid = ((kw >= 0) & (kw < K)).astype(np.float32)
    kw_c = np.clip(kw, 0, K - 1)

    band = w_hwio[:, kw_c, :, :]                           # (K, W_in, W_out, Cin, Cout)
    band = band * valid[None, :, :, None, None]
    band = jnp.transpose(band, (0, 1, 3, 2, 4))            # (K, W_in, Cin, W_out, Cout)
    # TODO(synk): band is only ~3/W dense and grows quadratically in W; large-W shapes
    # need a W-tiled / block-banded formulation (guarded by the VMEM check below).
    return band.reshape(K, W * Cin, W * Cout).astype(dtype)


# ----------------------------------------------------------------------------- wrappers

@functools.partial(jax.jit, static_argnames=("layer", "eps", "neg_slope", "compute_dtype"))
def dblock_forward_folded(x_folded, weight_oihw, gamma, beta, *, layer="normal",
                          eps=1e-5, neg_slope=0.01, compute_dtype=jnp.bfloat16):
    """DBlock forward on channels-folded input.

    x_folded:    (B, H, W*Cin)  channels folded onto the lane axis
    weight_oihw: (Cout, Cin, K, K)  PyTorch Conv2d layout
    gamma, beta: (Cout,)
    returns:     (B, H, W*Cout)
    """
    B, H, WC_in = x_folded.shape
    Cout, Cin, K, _ = weight_oihw.shape
    W = WC_in // Cin
    # TODO(synk): pad = (K-1)//2 matches PyTorch padding=p only for odd K (K=3 here).
    pad = (K - 1) // 2
    use_bn = (layer == "normal")

    TH = _pick_row_tile(H)
    R = H // TH                   # exact: TH divides H by construction
    TS = TH + 2 * pad
    Hp = H + 2 * pad
    WC_out = W * Cout

    # VMEM budget sanity (per-step blocks, x2 for double buffering).
    csize = jnp.dtype(compute_dtype).itemsize
    est = 2 * (Hp * WC_in * csize + K * WC_in * WC_out * csize
               + TS * WC_out * 4 + TH * WC_out * 4 + 4 * WC_out * 4)
    if est > _VMEM_LIMIT:
        raise ValueError(
            f"DBlock Pallas kernel VMEM estimate {est} B exceeds {_VMEM_LIMIT} B; "
            "a W-tiled band formulation is required for this shape.")

    x_pad = jnp.pad(x_folded.astype(compute_dtype), ((0, 0), (pad, pad), (0, 0)))
    band = _build_band_weights(weight_oihw, W, pad, compute_dtype)

    x_spec = pl.BlockSpec((None, Hp, WC_in), lambda b, r: (b, 0, 0))      # resident per b
    band_spec = pl.BlockSpec((K, WC_in, WC_out), lambda b, r: (0, 0, 0))

    # ---------------- pass 1 (BN only): per-tile partial statistics ----------------
    if use_bn:
        part = pl.pallas_call(
            functools.partial(_stats_kernel, TH=TH, TS=TS, K=K),
            out_shape=jax.ShapeDtypeStruct((B, R, 2, WC_out), jnp.float32),
            grid_spec=pltpu.PrefetchScalarGridSpec(
                num_scalar_prefetch=0,
                grid=(B, R),
                in_specs=[x_spec, band_spec],
                out_specs=pl.BlockSpec((None, None, 2, WC_out),
                                       lambda b, r: (b, r, 0, 0))),
            compiler_params=pltpu.CompilerParams(
                dimension_semantics=("parallel", "parallel"),
                vmem_limit_bytes=_VMEM_LIMIT),
        )(x_pad, band)

        count = float(B * H * W)
        totals = jnp.sum(part, axis=(0, 1)).reshape(2, W, Cout).sum(axis=1)  # (2, Cout)
        mean = totals[0] / count
        # TODO(synk): E[x^2]-mean^2 in f32 can cancel for large-mean activations; the
        # clamp keeps rsqrt finite but a centered two-pass variance would be more robust.
        var = jnp.maximum(totals[1] / count - mean * mean, 0.0)
        scale = gamma.astype(jnp.float32) * jax.lax.rsqrt(var + eps)
        shift = beta.astype(jnp.float32) - mean * scale
        # TODO(synk): BatchNorm2d running_mean/running_var buffer updates (training-time
        # side effect) are not emitted; the forward output matches train-mode PyTorch.
    else:                                                   # layer == 'first': no BN
        scale = jnp.ones((Cout,), jnp.float32)
        shift = jnp.zeros((Cout,), jnp.float32)

    scale_row = jnp.tile(scale, W).reshape(1, WC_out)       # per-(w, co) lane broadcast
    shift_row = jnp.tile(shift, W).reshape(1, WC_out)

    # ---------------- pass 2: conv (recomputed) + scale/shift + LeakyReLU ----------
    out = pl.pallas_call(
        functools.partial(_conv_bn_act_kernel, TH=TH, TS=TS, K=K, neg_slope=neg_slope),
        out_shape=jax.ShapeDtypeStruct((B, H, WC_out), jnp.float32),
        grid_spec=pltpu.PrefetchScalarGridSpec(
            num_scalar_prefetch=0,
            grid=(B, R),
            in_specs=[x_spec, band_spec,
                      pl.BlockSpec((1, WC_out), lambda b, r: (0, 0)),
                      pl.BlockSpec((1, WC_out), lambda b, r: (0, 0))],
            out_specs=pl.BlockSpec((None, TH, WC_out), lambda b, r: (b, r, 0))),
        compiler_params=pltpu.CompilerParams(
            dimension_semantics=("parallel", "parallel"),
            vmem_limit_bytes=_VMEM_LIMIT),
    )(x_pad, band, scale_row, shift_row)
    return out


@functools.partial(jax.jit, static_argnames=("layer", "eps", "neg_slope", "compute_dtype"))
def dblock_forward(x_nchw, weight_oihw, gamma, beta, *, layer="normal",
                   eps=1e-5, neg_slope=0.01, compute_dtype=jnp.bfloat16):
    """NCHW entry point (PyTorch layout). Chained DBlocks should prefer the folded API."""
    B, Cin, H, W = x_nchw.shape
    Cout = weight_oihw.shape[0]
    x_folded = jnp.transpose(x_nchw, (0, 2, 3, 1)).reshape(B, H, W * Cin)
    out_f = dblock_forward_folded(x_folded, weight_oihw, gamma, beta, layer=layer,
                                  eps=eps, neg_slope=neg_slope,
                                  compute_dtype=compute_dtype)
    return jnp.transpose(out_f.reshape(B, H, W, Cout), (0, 3, 1, 2))


# ----------------------------------------------------------------------------- reference

def _reference(x_nchw, weight_oihw, gamma, beta, *, layer="normal",
               eps=1e-5, neg_slope=0.01):
    """Pure-JAX reference (matches PyTorch forward of a fresh DBlock in train mode)."""
    x_nhwc = jnp.transpose(x_nchw, (0, 2, 3, 1))
    w_hwio = jnp.transpose(weight_oihw, (2, 3, 1, 0))
    y = jax.lax.conv_general_dilated(
        x_nhwc, w_hwio, window_strides=(1, 1), padding="SAME",
        dimension_numbers=("NHWC", "HWIO", "NHWC"))
    if layer == "normal":
        mean = jnp.mean(y, axis=(0, 1, 2))
        var = jnp.mean((y - mean) ** 2, axis=(0, 1, 2))
        y = (y - mean) * jax.lax.rsqrt(var + eps) * gamma + beta
    y = jnp.where(y > 0, y, neg_slope * y)
    return jnp.transpose(y, (0, 3, 1, 2))


if __name__ == "__main__":
    # Shapes consistent with DBlock(in_features=4, out_features=8, k=3, s=1, p=1)
    B, Cin, Cout, H, W, K = 2, 4, 8, 16, 16, 3

    key = jax.random.PRNGKey(0)
    kx, kw, kg, kb = jax.random.split(key, 4)
    x = jax.random.normal(kx, (B, Cin, H, W), dtype=jnp.float32)
    weight = 0.1 * jax.random.normal(kw, (Cout, Cin, K, K), dtype=jnp.float32)
    gamma = 1.0 + 0.1 * jax.random.normal(kg, (Cout,), dtype=jnp.float32)
    beta = 0.1 * jax.random.normal(kb, (Cout,), dtype=jnp.float32)

    ref_n = _reference(x, weight, gamma, beta, layer="normal")
    ref_f = _reference(x, weight, gamma, beta, layer="first")

    # Strict check of the kernel math on the f32 MXU path.
    out_f32 = jax.block_until_ready(
        dblock_forward(x, weight, gamma, beta, layer="normal", compute_dtype=jnp.float32))
    np.testing.assert_allclose(np.asarray(out_f32), np.asarray(ref_n), atol=1e-4, rtol=1e-4)

    # Default bf16-MXU path (per perf review); tolerance reflects bf16 conv inputs.
    out_bf = jax.block_until_ready(dblock_forward(x, weight, gamma, beta, layer="normal"))
    np.testing.assert_allclose(np.asarray(out_bf), np.asarray(ref_n), atol=3e-2, rtol=3e-2)
    assert out_bf.shape == (B, Cout, H, W)

    # layer='first': Conv -> LeakyReLU (no BN, stats pass skipped entirely)
    out_first = jax.block_until_ready(dblock_forward(x, weight, gamma, beta, layer="first"))
    np.testing.assert_allclose(np.asarray(out_first), np.asarray(ref_f), atol=3e-2, rtol=3e-2)

    print("KERNEL_OK")
</pallas_src>

<mosaic_0001>
module attributes {stable_mosaic.version = 11 : i64} {
  func.func @_stats_kernel(%arg0: i32, %arg1: i32, %arg2: memref<1x18x64xf32, #tpu.memory_space<vmem>>, %arg3: memref<3x64x128xf32, #tpu.memory_space<vmem>>, %arg4: memref<1x1x2x128xf32, #tpu.memory_space<vmem>>) attributes {dimension_semantics = [#tpu.dimension_semantics<parallel>, #tpu.dimension_semantics<parallel>], iteration_bounds = array<i64: 2, 1>, scalar_prefetch = 0 : i64, scratch_operands = 0 : i64, tpu.core_type = #tpu.core_type<tc>, window_params = [{transform_indices = @transform_0, window_bounds = array<i64: 1, 18, 64>}, {pipeline_mode = #tpu.pipeline_mode<synchronous>, transform_indices = @transform_1, window_bounds = array<i64: 3, 64, 128>}, {transform_indices = @transform_2, window_bounds = array<i64: 1, 1, 2, 128>}]} {
    %c16_i32 = arith.constant 16 : i32
    %0 = arith.muli %arg1, %c16_i32 : i32
    %1 = tpu.assume_multiple %0, 8 : i32
    %c0 = arith.constant 0 : index
    %2 = arith.index_cast %1 : i32 to index
    %c0_0 = arith.constant 0 : index
    %3 = vector.load %arg2[%c0, %2, %c0_0] : memref<1x18x64xf32, #tpu.memory_space<vmem>>, vector<1x18x64xf32>
    %4 = vector.shape_cast %3 : vector<1x18x64xf32> to vector<18x64xf32>
    %c0_1 = arith.constant 0 : index
    %c0_2 = arith.constant 0 : index
    %c0_3 = arith.constant 0 : index
    %5 = vector.load %arg3[%c0_1, %c0_2, %c0_3] : memref<3x64x128xf32, #tpu.memory_space<vmem>>, vector<1x64x128xf32>
    %6 = vector.shape_cast %5 : vector<1x64x128xf32> to vector<64x128xf32>
    %cst = arith.constant dense<0.000000e+00> : vector<18x128xf32>
    %7 = tpu.matmul %4, %6, %cst {dimension_numbers = #tpu.dot_dimension_numbers<[1], [0], [0], [1], [0, 0, 1, 1], [], []>} : vector<18x64xf32>, vector<64x128xf32>, vector<18x128xf32> -> vector<18x128xf32>
    %c1 = arith.constant 1 : index
    %c0_4 = arith.constant 0 : index
    %c0_5 = arith.constant 0 : index
    %8 = vector.load %arg3[%c1, %c0_4, %c0_5] : memref<3x64x128xf32, #tpu.memory_space<vmem>>, vector<1x64x128xf32>
    %9 = vector.shape_cast %8 : vector<1x64x128xf32> to vector<64x128xf32>
    %cst_6 = arith.constant dense<0.000000e+00> : vector<18x128xf32>
    %10 = tpu.matmul %4, %9, %cst_6 {dimension_numbers = #tpu.dot_dimension_numbers<[1], [0], [0], [1], [0, 0, 1, 1], [], []>} : vector<18x64xf32>, vector<64x128xf32>, vector<18x128xf32> -> vector<18x128xf32>
    %c2 = arith.constant 2 : index
    %c0_7 = arith.constant 0 : index
    %c0_8 = arith.constant 0 : index
    %11 = vector.load %arg3[%c2, %c0_7, %c0_8] : memref<3x64x128xf32, #tpu.memory_space<vmem>>, vector<1x64x128xf32>
    %12 = vector.shape_cast %11 : vector<1x64x128xf32> to vector<64x128xf32>
    %cst_9 = arith.constant dense<0.000000e+00> : vector<18x128xf32>
    %13 = tpu.matmul %4, %12, %cst_9 {dimension_numbers = #tpu.dot_dimension_numbers<[1], [0], [0], [1], [0, 0, 1, 1], [], []>} : vector<18x64xf32>, vector<64x128xf32>, vector<18x128xf32> -> vector<18x128xf32>
    %14 = vector.extract_strided_slice %7 {offsets = [0, 0], sizes = [16, 128], strides = [1, 1]} : vector<18x128xf32> to vector<16x128xf32>
    %15 = vector.extract_strided_slice %10 {offsets = [1, 0], sizes = [16, 128], strides = [1, 1]} : vector<18x128xf32> to vector<16x128xf32>
    %16 = arith.addf %14, %15 : vector<16x128xf32>
    %17 = vector.extract_strided_slice %13 {offsets = [2, 0], sizes = [16, 128], strides = [1, 1]} : vector<18x128xf32> to vector<16x128xf32>
    %18 = arith.addf %16, %17 : vector<16x128xf32>
    %cst_10 = arith.constant dense<0.000000e+00> : vector<128xf32>
    %19 = vector.multi_reduction <add>, %18, %cst_10 [0] : vector<16x128xf32> to vector<128xf32>
    %20 = vector.shape_cast %19 : vector<128xf32> to vector<1x128xf32>
    %21 = arith.mulf %18, %18 : vector<16x128xf32>
    %cst_11 = arith.constant dense<0.000000e+00> : vector<128xf32>
    %22 = vector.multi_reduction <add>, %21, %cst_11 [0] : vector<16x128xf32> to vector<128xf32>
    %23 = vector.shape_cast %22 : vector<128xf32> to vector<1x128xf32>
    %24 = tpu.concatenate %20, %23 in 0 : vector<1x128xf32>, vector<1x128xf32> -> vector<2x128xf32>
    %c0_12 = arith.constant 0 : index
    %c0_13 = arith.constant 0 : index
    %c0_14 = arith.constant 0 : index
    %c0_15 = arith.constant 0 : index
    %25 = vector.load %arg4[%c0_12, %c0_13, %c0_14, %c0_15] : memref<1x1x2x128xf32, #tpu.memory_space<vmem>>, vector<1x1x2x128xf32>
    %26 = vector.shape_cast %25 : vector<1x1x2x128xf32> to vector<2x128xf32>
    %27 = vector.shape_cast %24 : vector<2x128xf32> to vector<1x1x2x128xf32>
    tpu.vector_store %arg4[%c0_12, %c0_13, %c0_14, %c0_15], %27 {strides = array<i32>} : memref<1x1x2x128xf32, #tpu.memory_space<vmem>>, vector<1x1x2x128xf32>,
    return
  }
  func.func @transform_0(%arg0: i32, %arg1: i32) -> (i32, i32, i32) {
    %c0_i32 = arith.constant 0 : i32
    %c0_i32_0 = arith.constant 0 : i32
    %c0_i32_1 = arith.constant 0 : i32
    return %arg0, %c0_i32, %c0_i32_0 : i32, i32, i32
  }
  func.func @transform_1(%arg0: i32, %arg1: i32) -> (i32, i32, i32) {
    %c0_i32 = arith.constant 0 : i32
    %c0_i32_0 = arith.constant 0 : i32
    %c0_i32_1 = arith.constant 0 : i32
    %c0_i32_2 = arith.constant 0 : i32
    return %c0_i32, %c0_i32_0, %c0_i32_1 : i32, i32, i32
  }
  func.func @transform_2(%arg0: i32, %arg1: i32) -> (i32, i32, i32, i32) {
    %c0_i32 = arith.constant 0 : i32
    %c0_i32_0 = arith.constant 0 : i32
    %c0_i32_1 = arith.constant 0 : i32
    return %arg0, %arg1, %c0_i32, %c0_i32_0 : i32, i32, i32, i32
  }
}

module attributes {stable_mosaic.version = 11 : i64} {
  func.func @_conv_bn_act_kernel(%arg0: i32, %arg1: i32, %arg2: memref<1x18x64xf32, #tpu.memory_space<vmem>>, %arg3: memref<3x64x128xf32, #tpu.memory_space<vmem>>, %arg4: memref<1x128xf32, #tpu.memory_space<vmem>>, %arg5: memref<1x128xf32, #tpu.memory_space<vmem>>, %arg6: memref<1x16x128xf32, #tpu.memory_space<vmem>>) attributes {dimension_semantics = [#tpu.dimension_semantics<parallel>, #tpu.dimension_semantics<parallel>], iteration_bounds = array<i64: 2, 1>, scalar_prefetch = 0 : i64, scratch_operands = 0 : i64, tpu.core_type = #tpu.core_type<tc>, window_params = [{transform_indices = @transform_0, window_bounds = array<i64: 1, 18, 64>}, {pipeline_mode = #tpu.pipeline_mode<synchronous>, transform_indices = @transform_1, window_bounds = array<i64: 3, 64, 128>}, {pipeline_mode = #tpu.pipeline_mode<synchronous>, transform_indices = @transform_2, window_bounds = array<i64: 1, 128>}, {pipeline_mode = #tpu.pipeline_mode<synchronous>, transform_indices = @transform_3, window_bounds = array<i64: 1, 128>}, {transform_indices = @transform_4, window_bounds = array<i64: 1, 16, 128>}]} {
    %c16_i32 = arith.constant 16 : i32
    %0 = arith.muli %arg1, %c16_i32 : i32
    %1 = tpu.assume_multiple %0, 8 : i32
    %c0 = arith.constant 0 : index
    %2 = arith.index_cast %1 : i32 to index
    %c0_0 = arith.constant 0 : index
    %3 = vector.load %arg2[%c0, %2, %c0_0] : memref<1x18x64xf32, #tpu.memory_space<vmem>>, vector<1x18x64xf32>
    %4 = vector.shape_cast %3 : vector<1x18x64xf32> to vector<18x64xf32>
    %c0_1 = arith.constant 0 : index
    %c0_2 = arith.constant 0 : index
    %c0_3 = arith.constant 0 : index
    %5 = vector.load %arg3[%c0_1, %c0_2, %c0_3] : memref<3x64x128xf32, #tpu.memory_space<vmem>>, vector<1x64x128xf32>
    %6 = vector.shape_cast %5 : vector<1x64x128xf32> to vector<64x128xf32>
    %cst = arith.constant dense<0.000000e+00> : vector<18x128xf32>
    %7 = tpu.matmul %4, %6, %cst {dimension_numbers = #tpu.dot_dimension_numbers<[1], [0], [0], [1], [0, 0, 1, 1], [], []>} : vector<18x64xf32>, vector<64x128xf32>, vector<18x128xf32> -> vector<18x128xf32>
    %c1 = arith.constant 1 : index
    %c0_4 = arith.constant 0 : index
    %c0_5 = arith.constant 0 : index
    %8 = vector.load %arg3[%c1, %c0_4, %c0_5] : memref<3x64x128xf32, #tpu.memory_space<vmem>>, vector<1x64x128xf32>
    %9 = vector.shape_cast %8 : vector<1x64x128xf32> to vector<64x128xf32>
    %cst_6 = arith.constant dense<0.000000e+00> : vector<18x128xf32>
    %10 = tpu.matmul %4, %9, %cst_6 {dimension_numbers = #tpu.dot_dimension_numbers<[1], [0], [0], [1], [0, 0, 1, 1], [], []>} : vector<18x64xf32>, vector<64x128xf32>, vector<18x128xf32> -> vector<18x128xf32>
    %c2 = arith.constant 2 : index
    %c0_7 = arith.constant 0 : index
    %c0_8 = arith.constant 0 : index
    %11 = vector.load %arg3[%c2, %c0_7, %c0_8] : memref<3x64x128xf32, #tpu.memory_space<vmem>>, vector<1x64x128xf32>
    %12 = vector.shape_cast %11 : vector<1x64x128xf32> to vector<64x128xf32>
    %cst_9 = arith.constant dense<0.000000e+00> : vector<18x128xf32>
    %13 = tpu.matmul %4, %12, %cst_9 {dimension_numbers = #tpu.dot_dimension_numbers<[1], [0], [0], [1], [0, 0, 1, 1], [], []>} : vector<18x64xf32>, vector<64x128xf32>, vector<18x128xf32> -> vector<18x128xf32>
    %14 = vector.extract_strided_slice %7 {offsets = [0, 0], sizes = [16, 128], strides = [1, 1]} : vector<18x128xf32> to vector<16x128xf32>
    %15 = vector.extract_strided_slice %10 {offsets = [1, 0], sizes = [16, 128], strides = [1, 1]} : vector<18x128xf32> to vector<16x128xf32>
    %16 = arith.addf %14, %15 : vector<16x128xf32>
    %17 = vector.extract_strided_slice %13 {offsets = [2, 0], sizes = [16, 128], strides = [1, 1]} : vector<18x128xf32> to vector<16x128xf32>
    %18 = arith.addf %16, %17 : vector<16x128xf32>
    %c0_10 = arith.constant 0 : index
    %c0_11 = arith.constant 0 : index
    %19 = vector.load %arg4[%c0_10, %c0_11] : memref<1x128xf32, #tpu.memory_space<vmem>>, vector<1x128xf32>
    %20 = vector.broadcast %19 : vector<1x128xf32> to vector<16x128xf32>
    %21 = arith.mulf %18, %20 : vector<16x128xf32>
    %c0_12 = arith.constant 0 : index
    %c0_13 = arith.constant 0 : index
    %22 = vector.load %arg5[%c0_12, %c0_13] : memref<1x128xf32, #tpu.memory_space<vmem>>, vector<1x128xf32>
    %23 = vector.broadcast %22 : vector<1x128xf32> to vector<16x128xf32>
    %24 = arith.addf %21, %23 : vector<16x128xf32>
    %cst_14 = arith.constant 0.000000e+00 : f32
    %25 = vector.broadcast %cst_14 : f32 to vector<16x128xf32>
    %26 = arith.cmpf ogt, %24, %25 : vector<16x128xf32>
    %cst_15 = arith.constant 0.00999999977 : f32
    %27 = vector.broadcast %cst_15 : f32 to vector<16x128xf32>
    %28 = arith.mulf %27, %24 : vector<16x128xf32>
    %29 = arith.select %26, %24, %28 : vector<16x128xi1>, vector<16x128xf32>
    %c0_16 = arith.constant 0 : index
    %c0_17 = arith.constant 0 : index
    %c0_18 = arith.constant 0 : index
    %30 = vector.load %arg6[%c0_16, %c0_17, %c0_18] : memref<1x16x128xf32, #tpu.memory_space<vmem>>, vector<1x16x128xf32>
    %31 = vector.shape_cast %30 : vector<1x16x128xf32> to vector<16x128xf32>
    %32 = vector.shape_cast %29 : vector<16x128xf32> to vector<1x16x128xf32>
    tpu.vector_store %arg6[%c0_16, %c0_17, %c0_18], %32 {strides = array<i32>} : memref<1x16x128xf32, #tpu.memory_space<vmem>>, vector<1x16x128xf32>,
    return
  }
  func.func @transform_0(%arg0: i32, %arg1: i32) -> (i32, i32, i32) {
    %c0_i32 = arith.constant 0 : i32
    %c0_i32_0 = arith.constant 0 : i32
    %c0_i32_1 = arith.constant 0 : i32
    return %arg0, %c0_i32, %c0_i32_0 : i32, i32, i32
  }
  func.func @transform_1(%arg0: i32, %arg1: i32) -> (i32, i32, i32) {
    %c0_i32 = arith.constant 0 : i32
    %c0_i32_0 = arith.constant 0 : i32
    %c0_i32_1 = arith.constant 0 : i32
    %c0_i32_2 = arith.constant 0 : i32
    return %c0_i32, %c0_i32_0, %c0_i32_1 : i32, i32, i32
  }
  func.func @transform_2(%arg0: i32, %arg1: i32) -> (i32, i32) {
    %c0_i32 = arith.constant 0 : i32
    %c0_i32_0 = arith.constant 0 : i32
    %c0_i32_1 = arith.constant 0 : i32
    return %c0_i32, %c0_i32_0 : i32, i32
  }
  func.func @transform_3(%arg0: i32, %arg1: i32) -> (i32, i32) {
    %c0_i32 = arith.constant 0 : i32
    %c0_i32_0 = arith.constant 0 : i32
    %c0_i32_1 = arith.constant 0 : i32
    return %c0_i32, %c0_i32_0 : i32, i32
  }
  func.func @transform_4(%arg0: i32, %arg1: i32) -> (i32, i32, i32) {
    %c0_i32 = arith.constant 0 : i32
    %c0_i32_0 = arith.constant 0 : i32
    return %arg0, %arg1, %c0_i32 : i32, i32, i32
  }
}

</mosaic_0001>

<bundles_post_ra>
// kernel: tile.13
= control target key start
LH: loop header
LB: loop body
LE: loop exit
PB: predicated region body
PF: predicated region fallthrough
CT: control target
= control target key end

     0   :  { %s28_s0 = inlined_call_operand.vmem [shape: f32[8], index: 0, kind: input, shape index: {}]   ;;  %s29_s1 = inlined_call_operand.vmem [shape: f32[16,8], index: 1, kind: output, shape index: {}]  }
   0x1   :  { %v4_v0 = vld [vmem:[%s28_s0] ss:$0 sm:$0xff] }
   0x2   :  { %5 = vst [vmem:[%s29_s1] sm:$0xff] %v4_v0 }
   0x3   :  { %8 = vst [vmem:[%s29_s1 + $0x8] sm:$0xff] %v4_v0 }

// kernel: tile.14
= control target key start
LH: loop header
LB: loop body
LE: loop exit
PB: predicated region body
PF: predicated region fallthrough
CT: control target
= control target key end

     0   :  { %s131_s10 = smov 120   ;;  %s132_s11 = smov 104   ;;  %vm3_vm0 = vcmask 64512   ;;  %vm9_vm1 = vcmask 1048512   ;;  %vm15_vm2 = vcmask 982912   ;;  %vm21_vm3 = vcmask 917312   ;;  %s207_s0 = inlined_call_operand.vmem [shape: f32[16,8], index: 0, kind: input, shape index: {}]   ;;  %s208_s1 = inlined_call_operand.vmem [shape: f32[1,128], index: 1, kind: output, shape index: {}]  }
   0x1   :  { %v101_v0 = vld [vmem:[%s207_s0 + $0xf] sm:$0x1]   ;;  %v103_v1 = vld [vmem:[%s207_s0 + $0xd] sm:$0x1]   ;;  %v105_v2 = vld [vmem:[%s207_s0 + $0xb] sm:$0x1]  }
   0x2   :  { %7 = vrot.lane.b32.xlu0 %v101_v0, %s131_s10  ;;  %19 = vrot.lane.b32.xlu1 %v103_v1, %s132_s11  ;;  %s133_s14 = smov 88   ;;  %v102_v3 = vld [vmem:[%s207_s0 + $0xe] sm:$0x1]   ;;  %v104_v4 = vld [vmem:[%s207_s0 + $0xc] sm:$0x1]   ;;  %s134_s19 = smov 112  }
   0x3   :  { %31 = vrot.lane.b32.xlu2 %v105_v2, %s133_s14  ;;  %s135_s20 = smov 96   ;;  %v106_v5 = vld [vmem:[%s207_s0 + $0xa] sm:$0x1]   ;;  %s136_s23 = smov 80   ;;  %v107_v6 = vld [vmem:[%s207_s0 + $0x9] sm:$0x1]  }
   0x4   :  { %v108_v7 = vld [vmem:[%s207_s0 + $0x8] sm:$0x1]   ;;  %s137_s28 = smov 72   ;;  %s138_s29 = smov 64   ;;  %v109_v8 = vld [vmem:[%s207_s0 + $0x7] sm:$0x1]  }
   0x5   :  { %s139_s3 = smov 56   ;;  %v110_v9 = vld [vmem:[%s207_s0 + $0x6] sm:$0x1]   ;;  %v111_v10 = vld [vmem:[%s207_s0 + $0x5] sm:$0x1]   ;;  %s140_s8 = smov 48  }
   0x6   :  { %s141_s9 = smov 40   ;;  %v112_v11 = vld [vmem:[%s207_s0 + $0x4] sm:$0x1]   ;;  %s142_s12 = smov 32   ;;  %v113_v12 = vld [vmem:[%s207_s0 + $0x3] sm:$0x1]  }
   0x7   :  { %v114_v13 = vld [vmem:[%s207_s0 + $0x2] sm:$0x1]   ;;  %s143_s17 = smov 24   ;;  %s144_s18 = smov 16   ;;  %v115_v14 = vld [vmem:[%s207_s0 + $0x1] sm:$0x1]  }
   0x8   :  { %s145_s21 = smov 8   ;;  %v2_v15 = vld [vmem:[%s207_s0] sm:$0x1]   ;;  %vm27_vm4 = vcmask 851712   ;;  %vm33_vm5 = vcmask 786112   ;;  %vm39_vm6 = vcmask 720512  }
   0x9   :  { %4 = vst.msk [vmem:[#allocation0] sm:$0x1] %vm3_vm0, %v2_v15   ;;  %vm45_vm7 = vcmask 654912   ;;  %vm51_vm8 = vcmask 589312   ;;  %vm57_vm9 = vcmask 523712   ;;  %vm63_vm10 = vcmask 458112  }
   0xa   :  { %13 = vrot.lane.b32.xlu0 %v102_v3, %s134_s19  ;;  %25 = vrot.lane.b32.xlu1 %v104_v4, %s135_s20  ;;  %vm69_vm11 = vcmask 392512   ;;  %vm75_vm12 = vcmask 326912   ;;  %vm81_vm13 = vcmask 261312   ;;  %vm87_vm14 = vcmask 195712  }
   0xb   :  { %37 = vrot.lane.b32.xlu2 %v106_v5, %s136_s23  ;;  %vm93_vm15 = vcmask 130112  }
  0x12   :  { %43 = vrot.lane.b32.xlu0 %v107_v6, %s137_s28  ;;  %49 = vrot.lane.b32.xlu1 %v108_v7, %s138_s29 }
  0x13   :  { %55 = vrot.lane.b32.xlu2 %v109_v8, %s139_s3 }
  0x1a   :  { %61 = vrot.lane.b32.xlu0 %v110_v9, %s140_s8  ;;  %67 = vrot.lane.b32.xlu1 %v111_v10, %s141_s9 }
  0x1b   :  { %73 = vrot.lane.b32.xlu2 %v112_v11, %s142_s12 }
  0x22   :  { %79 = vrot.lane.b32.xlu0 %v113_v12, %s143_s17  ;;  %85 = vrot.lane.b32.xlu1 %v114_v13, %s144_s18 }
  0x23   :  { %91 = vrot.lane.b32.xlu2 %v115_v14, %s145_s21 }
  0x5d   :  { %v32_v16 = vpop.permute.xlu2 %31  }
  0x65   :  { %v38_v17 = vpop.permute.xlu2 %37  }
  0x6d   :  { %v56_v18 = vpop.permute.xlu2 %55  }
  0x74   :  { %v8_v19 = vpop.permute.xlu0 %7   ;;  %v20_v20 = vpop.permute.xlu1 %19  }
  0x75   :  { %10 = vst.msk [vmem:[#allocation0] sm:$0x1] %vm9_vm1, %v8_v19   ;;  %v74_v21 = vpop.permute.xlu2 %73  }
  0x7c   :  { %v14_v22 = vpop.permute.xlu0 %13   ;;  %v26_v23 = vpop.permute.xlu1 %25  }
  0x7d   :  { %16 = vst.msk [vmem:[#allocation0] sm:$0x1] %vm15_vm2, %v14_v22   ;;  %v92_v24 = vpop.permute.xlu2 %91  }
  0x7e   :  { %22 = vst.msk [vmem:[#allocation0] sm:$0x1] %vm21_vm3, %v20_v20  }
  0x7f   :  { %28 = vst.msk [vmem:[#allocation0] sm:$0x1] %vm27_vm4, %v26_v23  }
  0x80   :  { %34 = vst.msk [vmem:[#allocation0] sm:$0x1] %vm33_vm5, %v32_v16  }
  0x81   :  { %40 = vst.msk [vmem:[#allocation0] sm:$0x1] %vm39_vm6, %v38_v17  }
  0x84   :  { %v44_v25 = vpop.permute.xlu0 %43   ;;  %v50_v26 = vpop.permute.xlu1 %49  }
  0x85   :  { %46 = vst.msk [vmem:[#allocation0] sm:$0x1] %vm45_vm7, %v44_v25  }
  0x86   :  { %52 = vst.msk [vmem:[#allocation0] sm:$0x1] %vm51_vm8, %v50_v26  }
  0x87   :  { %58 = vst.msk [vmem:[#allocation0] sm:$0x1] %vm57_vm9, %v56_v18  }
  0x8c   :  { %v62_v27 = vpop.permute.xlu0 %61   ;;  %v68_v28 = vpop.permute.xlu1 %67  }
  0x8d   :  { %64 = vst.msk [vmem:[#allocation0] sm:$0x1] %vm63_vm10, %v62_v27  }
  0x8e   :  { %70 = vst.msk [vmem:[#allocation0] sm:$0x1] %vm69_vm11, %v68_v28  }
  0x8f   :  { %76 = vst.msk [vmem:[#allocation0] sm:$0x1] %vm75_vm12, %v74_v21  }
  0x94   :  { %v80_v29 = vpop.permute.xlu0 %79   ;;  %v86_v30 = vpop.permute.xlu1 %85  }
  0x95   :  { %82 = vst.msk [vmem:[#allocation0] sm:$0x1] %vm81_vm13, %v80_v29  }
  0x96   :  { %88 = vst.msk [vmem:[#allocation0] sm:$0x1] %vm87_vm14, %v86_v30  }
  0x97   :  { %94 = vst.msk [vmem:[#allocation0] sm:$0x1] %vm93_vm15, %v92_v24  }
  0x9e   :  { %v97_v31 = vld [vmem:[#allocation0] sm:$0x1] }
  0x9f   :  { %100 = vst [vmem:[%s208_s1] sm:$0x1] %v97_v31 }

// kernel: dblock_forward_folded.3
= control target key start
LH: loop header
LB: loop body
LE: loop exit
PB: predicated region body
PF: predicated region fallthrough
CT: control target
= control target key end

     0   :  { %9 = vsyncpa [#allocation3], 0  ;;  %s874_s0 = inlined_call_operand.vmem [shape: f32[2,18,64], index: 0, kind: input, shape index: {}]   ;;  %s875_s1 = inlined_call_operand.vmem [shape: f32[3,64,128], index: 1, kind: input, shape index: {}]   ;;  %s876_s2 = inlined_call_operand.vmem [shape: f32[1,128], index: 2, kind: input, shape index: {}]   ;;  %s877_s3 = inlined_call_operand.vmem [shape: f32[1,128], index: 3, kind: input, shape index: {}]   ;;  %s878_s4 = inlined_call_operand.hbm [shape: f32[2,16,128], index: 4, kind: output, shape index: {}]  }
   0x1   :  { %11 = vsyncpa [#allocation3 + $0x1], 0  ;;  %s681_s15 = smov 0   ;;  %s683_s16 = smov 0  }
   0x2   :  { %s685_s17 = smov 0   ;;  %s687_s18 = smov 0  }
   0x3   :  { %s689_s19 = smov 0   ;;  %s691_s20 = smov 0  }
   0x4 LB: > { %s468_s21 = sadd.s32 4294967295, %s652_s20   ;;  %s469_s22 = sadd.s32 4294967294, %s652_s20   ;;  %s652_s20 = sphi %s691_s20, %s17_s20   ;;  %s648_s19 = sphi %s689_s19, %s885_s19   ;;  %s644_s18 = sphi %s687_s18, %s884_s18   ;;  %s640_s17 = sphi %s685_s17, %s883_s17   ;;  %s636_s16 = sphi %s683_s16, %s882_s16   ;;  %s632_s15 = sphi %s681_s15, %s881_s15  }
   0x5   : > { %s29_s23 = sadd.s32 1, %s648_s19  ;;  %s127_s24 = sadd.s32 1, %s640_s17 }
   0x6   : > { %p31_p0 = scmp.ge.s32.totalorder %s29_s23, 2  ;;  %p137_p1 = scmp.ne.s32.totalorder %s640_s17, %s636_s16 }
   0x7   : > { %p138_p2 = scmp.eq.s32.totalorder %s468_s21, 1  ;;  %p143_p3 = scmp.ne.s32.totalorder %s636_s16, %s632_s15 }
   0x8   : > { %s887_s23 = smov (%p31_p0, %s29_s23), 0  ;;  %p144_p5 = scmp.eq.s32.totalorder %s469_s22, 1 }
   0x9   : > { %p721_p4 = por %p138_p2, %p137_p1  ;;  %s122_s26 = ssub.s32 %s648_s19, %s887_s23 }
   0xa   : > { %p472_p6 = scmp.ge.s32.totalorder %s652_s20, 1  ;;  %p125_p7 = scmp.eq.s32.totalorder %s122_s26, 0 }
   0xb   : > { %p728_p8 = por %p144_p5, %p143_p3  ;;  %p179_p9 = scmp.lt.s32.totalorder %s652_s20, 3 }
   0xc   : > { %s734_s28 = scalar_select %p125_p7, %s640_s17, %s127_s24  }
   0xd   : > { %p180_p10 = pnand %p472_p6, %p179_p9 }
   0xe   : > { %p205_p11 = scmp.lt.s32.totalorder (!%p180_p10), %s644_s18, 1  ;;  %s202_s13 = sand.u32 (!%p180_p10), 1, %s636_s16  }
   0xf   : > { %183 = sbr.rel (%p180_p10) target bundleno = 201 (0xc9), region = 36  ;;  %s473_s14 = sshll.u32 (!%p180_p10), %s202_s13, 4 }
  0x10   : > { %s505_s22 = sshll.u32 (!%p180_p10), %s644_s18, 4  ;;  %s594_s9 = scalar_lea.hbm (!%p180_p10), %s878_s4, 32 }
  0x11   : > { %s389_s29 = scalar_lea.hbm (!%p180_p10), %s878_s4, %s505_s22 }
  0x14   : > { %v485_v0 = vld [vmem:[%s875_s1 + $0x78] sm:$0xff]  ;;  %v484_v2 = vld [vmem:[%s875_s1 + $0x70] sm:$0xff]  ;;  %v483_v4 = vld [vmem:[%s875_s1 + $0x68] sm:$0xff]  ;;  %s206_s21 = scalar_select %p205_p11, %s644_s18, 1  ;;  %vm224_vm0 = vcmask 523264   ;;  %vm332_vm1 = vcmask 1046528  }
  0x15   : > { %v496_v1 = vld [vmem:[%s875_s1 + $0xb8] sm:$0xff]  ;;  %276 = vmatpush.msra.mxu1 %v485_v0  ;;  %v495_v3 = vld [vmem:[%s875_s1 + $0xb0] sm:$0xff]  ;;  %v494_v5 = vld [vmem:[%s875_s1 + $0xa8] sm:$0xff]  ;;  %vm345_vm2 = vcmask 1045504   ;;  %s376_s18 = scalar_lea.sflag [#allocation3], %s202_s13 }
  0x16   : > { %311 = vmatpush.msra.mxu2 %v496_v1  ;;  %v482_v6 = vld [vmem:[%s875_s1 + $0x60] sm:$0xff]  ;;  %v223_v8 = vld [vmem:[%s875_s1 + $0x38] sm:$0xff]  ;;  %v222_v9 = vld [vmem:[%s875_s1 + $0x30] sm:$0xff]  ;;  %s514_s12 = smul.u32 24, %s206_s21  ;;  %s392_s21 = sshll.u32 %s389_s29, 4  ;;  %s393_s21 = int_to_ptr.hbm [resolvable:$true] %s392_s21 }
  0x17   : > { %277 = vmatpush.msra.mxu1 %v484_v2  ;;  %v493_v7 = vld [vmem:[%s875_s1 + $0xa0] sm:$0xff]  ;;  %v481_v10 = vld [vmem:[%s875_s1 + $0x58] sm:$0xff]  ;;  %242 = vmatpush.msra.mxu0 %v223_v8  ;;  %v221_v12 = vld [vmem:[%s875_s1 + $0x28] sm:$0xff]  ;;  %s588_s5 = sshra.s32 %s393_s21, 4  ;;  %s589_s5 = int_to_ptr.hbm [resolvable:$true] %s588_s5 }
  0x18   : > { %312 = vmatpush.msra.mxu2 %v495_v3  ;;  %v492_v11 = vld [vmem:[%s875_s1 + $0x98] sm:$0xff]  ;;  %506 = vmatpush.msra.mxu3 %v223_v8  ;;  %v480_v13 = vld [vmem:[%s875_s1 + $0x50] sm:$0xff]  ;;  %v220_v15 = vld [vmem:[%s875_s1 + $0x20] sm:$0xff]  ;;  %s795_s11 = scalar_lea.vmem %s874_s0, %s514_s12  ;;  %s204_s12 = scalar_lea.vmem [#allocation2], %s473_s14 }
  0x19   : > { %278 = vmatpush.msra.mxu1 %v483_v4  ;;  %v491_v14 = vld [vmem:[%s875_s1 + $0x90] sm:$0xff]  ;;  %243 = vmatpush.msra.mxu0 %v222_v9  ;;  %v479_v16 = vld [vmem:[%s875_s1 + $0x48] sm:$0xff]  ;;  %v219_v18 = vld [vmem:[%s875_s1 + $0x18] sm:$0xff]  ;;  %s390_s30 = sshll.u32 %s204_s12, 4  ;;  %s590_s6 = scalar_lea.hbm %s589_s5, 16  ;;  %s391_s30 = int_to_ptr.vmem [resolvable:$true] %s390_s30 }
  0x1a   : > { %313 = vmatpush.msra.mxu2 %v494_v5  ;;  %507 = vmatpush.msra.mxu3 %v222_v9  ;;  %v490_v17 = vld [vmem:[%s875_s1 + $0x88] sm:$0xff]  ;;  %v478_v19 = vld [vmem:[%s875_s1 + $0x40] sm:$0xff]  ;;  %v218_v22 = vld [vmem:[%s875_s1 + $0x10] sm:$0xff]  ;;  %p591_p12 = scmp.ne.s32.totalorder %s589_s5, %s590_s6  ;;  %p595_p1 = scmp.lt.s32.totalorder %s589_s5, %s878_s4 }
  0x1b   : > { %279 = vmatpush.msra.mxu1 %v482_v6  ;;  %244 = vmatpush.msra.mxu0 %v221_v12  ;;  %v489_v20 = vld [vmem:[%s875_s1 + $0x80] sm:$0xff]  ;;  %v217_v23 = vld [vmem:[%s875_s1 + $0x8] sm:$0xff]  ;;  %v215_v26 = vld [vmem:[%s795_s11 + $0x10] sm:$0x3]  ;;  %p596_p2 = scmp.lt.s32.totalorder %s594_s9, %s590_s6 }
  0x1c   : > { %314 = vmatpush.msra.mxu2 %v493_v7  ;;  %508 = vmatpush.msra.mxu3 %v221_v12  ;;  %v213_v21 = vld [vmem:[%s795_s11] sm:$0xff]  ;;  %v214_v25 = vld [vmem:[%s795_s11 + $0x8] sm:$0xff]  ;;  %p592_p13 = pnand %p591_p12, %p721_p4 }
  0x1d   : > { %280 = vmatpush.msra.mxu1 %v481_v10  ;;  %245 = vmatpush.msra.mxu0 %v220_v15  ;;  %v216_v24 = vld [vmem:[%s875_s1] sm:$0xff]  ;;  %p597_p3 = por %p596_p2, %p595_p1 }
  0x1e   : > { %315 = vmatpush.msra.mxu2 %v492_v11  ;;  %509 = vmatpush.msra.mxu3 %v220_v15  ;;  %v572_v39 = vld [vmem:[%s876_s2] ss:$0 sm:$0xff]  ;;  %p593_p0 = pneg %p592_p13 }
  0x1f   : > { %281 = vmatpush.msra.mxu1 %v480_v13  ;;  %246 = vmatpush.msra.mxu0 %v219_v18  ;;  %v573_v44 = vld [vmem:[%s877_s3] ss:$0 sm:$0xff] }
  0x20   : > { %316 = vmatpush.msra.mxu2 %v491_v14  ;;  %510 = vmatpush.msra.mxu3 %v219_v18  ;;  %p598_p5 = pnand %p597_p3, %p593_p0 }
  0x21   : > { %282 = vmatpush.msra.mxu1 %v479_v16  ;;  %247 = vmatpush.msra.mxu0 %v218_v22 }
  0x22   : > { %317 = vmatpush.msra.mxu2 %v490_v17  ;;  %511 = vmatpush.msra.mxu3 %v218_v22 }
  0x23   : > { %283 = vmatpush.msra.mxu1 %v478_v19  ;;  %248 = vmatpush.msra.mxu0 %v217_v23 }
  0x24   : > { %318 = vmatpush.msra.mxu2 %v489_v20  ;;  %486 = vmatmul.msk.f32.vlgmr.msra.gmra.mxu1 %vm224_vm0, %v213_v21 }
  0x25   : > { %497 = vmatmul.msk.f32.vlgmr.msra.gmra.mxu2 %vm224_vm0, %v213_v21  ;;  %512 = vmatpush.msra.mxu3 %v217_v23 }
  0x26   : > { %249 = vmatpush.msra.mxu0 %v216_v24 }
  0x27   : > { %513 = vmatpush.msra.mxu3 %v216_v24  ;;  %475 = vmatmul.msk.f32.vlgmr.msra.gmra.mxu0 %vm224_vm0, %v213_v21 }
  0x28   : > { %476 = vmatmul.msk.f32.vlgmr.msra.gmra.mxu3 %vm224_vm0, %v214_v25 }
  0x2c   : > { %487 = vmatmul.msk.f32.gmra.mxu1 %vm224_vm0, %v214_v25 }
  0x2d   : > { %498 = vmatmul.msk.f32.gmra.mxu2 %vm224_vm0, %v214_v25 }
  0x30   : > { %477 = vmatmul.msk.f32.gmra.mxu3 %vm224_vm0, %v215_v26 }
  0x34   : > { %488 = vmatmul.msk.f32.gmra.mxu1 %vm224_vm0, %v215_v26 }
  0x35   : > { %499 = vmatmul.msk.f32.gmra.mxu2 %vm224_vm0, %v215_v26 }
  0xa1   : > { %v285_v27 = vpop.f32.mrf.mxu1 }
  0xa2   : > { %v333_v31 = vrot.slane %v285_v27, 1 }
  0xa4   : > { %v251_v33 = vpop.f32.mrf.mxu0 }
  0xa8   : > { %v320_v28 = vpop.f32.mrf.mxu2 }
  0xa9   : > { %v288_v29 = vpop.f32.mrf.mxu1  ;;  %v346_v36 = vrot.slane %v320_v28, 2 }
  0xaa   : > { %v334_v30 = vrot.slane %v288_v29, 1 }
  0xab   : > { %v254_v32 = vpop.f32.mrf.mxu3 }
  0xac   : > { %v335_v34 = vsel %vm332_vm1, %v333_v31, %v334_v30 }
  0xad   : > { %v340_v38 = vadd.f32 %v335_v34, %v251_v33 }
  0xb0   : > { %v323_v35 = vpop.f32.mrf.mxu2 }
  0xb1   : > { %v347_v37 = vrot.slane %v323_v35, 2  ;;  %v291_v40 = vpop.f32.mrf.mxu1 }
  0xb2   : > { %v336_v42 = vrot.slane %v291_v40, 1 }
  0xb3   : > { %v348_v41 = vsel %vm345_vm2, %v346_v36, %v347_v37  ;;  %v257_v46 = vpop.f32.mrf.mxu3 }
  0xb4   : > { %v353_v43 = vadd.f32 %v348_v41, %v340_v38  ;;  %v337_v47 = vsel %vm332_vm1, %v334_v30, %v336_v42 }
  0xb5   : > { %v341_v52 = vadd.f32 %v337_v47, %v254_v32 }
  0xb6   : > { %v359_v45 = vmul.f32 %v572_v39, %v353_v43 }
  0xb8   : > { %v365_v48 = vadd.f32 %v573_v44, %v359_v45  ;;  %v326_v49 = vpop.f32.mrf.mxu2 }
  0xb9   : > { %v349_v50 = vrot.slane %v326_v49, 2 }
  0xba   : > { %vm367_vm3 = vcmp.gt.f32.partialorder %v365_v48, 0.0  ;;  %v369_v51 = vmul.f32 0.01, %v365_v48 }
  0xbb   : > { %v350_v53 = vsel %vm345_vm2, %v347_v37, %v349_v50 }
  0xbc   : > { %v354_v54 = vadd.f32 %v350_v53, %v341_v52  ;;  %v371_v55 = vsel %vm367_vm3, %v365_v48, %v369_v51 }
  0xbd   : > { %373 = vst [vmem:[%s204_s12] sm:$0xff] %v371_v55 }
  0xbe   : > { %v360_v56 = vmul.f32 %v572_v39, %v354_v54 }
  0xc0   : > { %v366_v57 = vadd.f32 %v573_v44, %v360_v56 }
  0xc2   : > { %vm368_vm4 = vcmp.gt.f32.partialorder %v366_v57, 0.0  ;;  %v370_v58 = vmul.f32 0.01, %v366_v57 }
  0xc4   : > { %v372_v59 = vsel %vm368_vm4, %v366_v57, %v370_v58 }
  0xc5   : > { %374 = vst [vmem:[%s204_s12 + $0x8] sm:$0xff] %v372_v59 }
  0xc6   : > { %601 = shalt.err (!%p598_p5)
}
  0xc7   : > { %s654_s13 = smov 128   ;;  %s655_s14 = smov 8  }
  0xc8   : > { %515 = dma.vmem_to_hbm [thread:$0]  (%p721_p4), %s391_s30, 256, %s393_s21, %s376_s18, %s654_s13, %s654_s13, %s655_s14  }
  0xc9 PF: > { %p521_p6 = scmp.ge.s32.totalorder %s652_s20, 2  ;;  %s407_s22 = sand.u32 1, %s632_s15  }
  0xca   : > { %s408_s24 = scalar_lea.sflag [#allocation3], %s407_s22 }
  0xcb   : > { %p518_p7 = pnand %p521_p6, %p728_p8 }
  0xcd   : > { %p519_p9 = pneg %p518_p7 }
  0xcf   : > { %627 = dma.done.wait (%p519_p9), %s408_s24, 256  }
  0xd0   : > { %629 = vsyncadd (%p519_p9), %s408_s24, 4294967040  ;;  %s17_s20 = sadd.s32 1, %s652_s20   ;;  %s881_s15 = smov %s636_s16 }
  0xd1   : > { %p14_p10 = scmp.ge.s32.totalorder %s17_s20, 4   ;;  %s882_s16 = smov %s640_s17 }
  0xd2   : > { %s883_s17 = smov %s734_s28  ;;  %s884_s18 = smov %s648_s19 }
  0xd3   : > { %s885_s19 = smov %s887_s23  ;;  %16 = sbr.rel (!%p14_p10) target bundleno = 4 (0x4), region = 74 }
  0xd8   :  { %414 = vsyncpa [#allocation3], 1 }
  0xd9   :  { %416 = vsyncpa [#allocation3 + $0x1], 1 }

// kernel: dblock_forward_folded.2
= control target key start
LH: loop header
LB: loop body
LE: loop exit
PB: predicated region body
PF: predicated region fallthrough
CT: control target
= control target key end

     0   :  { %s504_s9 = smov 0   ;;  %s506_s10 = smov 0   ;;  %s627_s0 = inlined_call_operand.vmem [shape: f32[2,18,64], index: 0, kind: input, shape index: {}]   ;;  %s628_s1 = inlined_call_operand.vmem [shape: f32[3,64,128], index: 1, kind: input, shape index: {}]   ;;  %s629_s2 = inlined_call_operand.vmem [shape: f32[2,1,2,128], index: 2, kind: output, shape index: {}]  }
   0x1   :  { %s508_s11 = smov 0  }
   0x2 LB: > { %s24_s12 = sadd.s32 1, %s483_s10  ;;  %p402_p0 = scmp.ge.s32.totalorder %s487_s11, 1  ;;  %s487_s11 = sphi %s508_s11, %s12_s11   ;;  %s483_s10 = sphi %s506_s10, %s631_s10   ;;  %s479_s9 = sphi %s504_s9, %s630_s9  }
   0x3   : > { %p26_p1 = scmp.ge.s32.totalorder %s24_s12, 2  ;;  %p126_p2 = scmp.lt.s32.totalorder %s487_s11, 3 }
   0x5   : > { %s633_s12 = smov (%p26_p1, %s24_s12), 0  ;;  %p127_p3 = pnand %p402_p0, %p126_p2 }
   0x6   : > { %p150_p4 = scmp.lt.s32.totalorder (!%p127_p3), %s479_s9, 1 }
   0x7   : > { %130 = sbr.rel (%p127_p3) target bundleno = 200 (0xc8), region = 28 }
   0xc   : > { %v415_v0 = vld [vmem:[%s628_s1 + $0x78] sm:$0xff]  ;;  %v414_v2 = vld [vmem:[%s628_s1 + $0x70] sm:$0xff]  ;;  %v413_v4 = vld [vmem:[%s628_s1 + $0x68] sm:$0xff]  ;;  %s635_s9 = smov (!%p150_p4, %s479_s9), 1  ;;  %vm175_vm0 = vcmask 523264   ;;  %vm283_vm1 = vcmask 1046528  }
   0xd   : > { %v426_v1 = vld [vmem:[%s628_s1 + $0xb8] sm:$0xff]  ;;  %227 = vmatpush.msra.mxu1 %v415_v0  ;;  %v425_v3 = vld [vmem:[%s628_s1 + $0xb0] sm:$0xff]  ;;  %v424_v5 = vld [vmem:[%s628_s1 + $0xa8] sm:$0xff]  ;;  %s440_s13 = smul.u32 24, %s635_s9  ;;  %vm296_vm2 = vcmask 1045504   ;;  %s404_s17 = sshll.u32 %s635_s9, 1 }
   0xe   : > { %262 = vmatpush.msra.mxu2 %v426_v1  ;;  %v412_v6 = vld [vmem:[%s628_s1 + $0x60] sm:$0xff]  ;;  %v174_v8 = vld [vmem:[%s628_s1 + $0x38] sm:$0xff]  ;;  %v173_v9 = vld [vmem:[%s628_s1 + $0x30] sm:$0xff]  ;;  %vm322_vm3 = vcmask 1040384   ;;  %s161_s20 = scalar_lea.vmem %s629_s2, %s404_s17 }
   0xf   : > { %228 = vmatpush.msra.mxu1 %v414_v2  ;;  %v423_v7 = vld [vmem:[%s628_s1 + $0xa0] sm:$0xff]  ;;  %v411_v10 = vld [vmem:[%s628_s1 + $0x58] sm:$0xff]  ;;  %193 = vmatpush.msra.mxu0 %v174_v8  ;;  %v172_v12 = vld [vmem:[%s628_s1 + $0x28] sm:$0xff]  ;;  %s582_s28 = scalar_lea.vmem %s627_s0, %s440_s13 }
  0x10   : > { %263 = vmatpush.msra.mxu2 %v425_v3  ;;  %v422_v11 = vld [vmem:[%s628_s1 + $0x98] sm:$0xff]  ;;  %432 = vmatpush.msra.mxu3 %v174_v8  ;;  %v410_v13 = vld [vmem:[%s628_s1 + $0x50] sm:$0xff]  ;;  %v171_v15 = vld [vmem:[%s628_s1 + $0x20] sm:$0xff] }
  0x11   : > { %229 = vmatpush.msra.mxu1 %v413_v4  ;;  %v421_v14 = vld [vmem:[%s628_s1 + $0x90] sm:$0xff]  ;;  %194 = vmatpush.msra.mxu0 %v173_v9  ;;  %v409_v16 = vld [vmem:[%s628_s1 + $0x48] sm:$0xff]  ;;  %v170_v18 = vld [vmem:[%s628_s1 + $0x18] sm:$0xff] }
  0x12   : > { %264 = vmatpush.msra.mxu2 %v424_v5  ;;  %433 = vmatpush.msra.mxu3 %v173_v9  ;;  %v420_v17 = vld [vmem:[%s628_s1 + $0x88] sm:$0xff]  ;;  %v408_v19 = vld [vmem:[%s628_s1 + $0x40] sm:$0xff]  ;;  %v169_v22 = vld [vmem:[%s628_s1 + $0x10] sm:$0xff] }
  0x13   : > { %230 = vmatpush.msra.mxu1 %v412_v6  ;;  %195 = vmatpush.msra.mxu0 %v172_v12  ;;  %v419_v20 = vld [vmem:[%s628_s1 + $0x80] sm:$0xff]  ;;  %v168_v23 = vld [vmem:[%s628_s1 + $0x8] sm:$0xff]  ;;  %v166_v26 = vld [vmem:[%s582_s28 + $0x10] sm:$0x3] }
  0x14   : > { %265 = vmatpush.msra.mxu2 %v423_v7  ;;  %434 = vmatpush.msra.mxu3 %v172_v12  ;;  %v164_v21 = vld [vmem:[%s582_s28] sm:$0xff]  ;;  %v165_v25 = vld [vmem:[%s582_s28 + $0x8] sm:$0xff] }
  0x15   : > { %231 = vmatpush.msra.mxu1 %v411_v10  ;;  %196 = vmatpush.msra.mxu0 %v171_v15  ;;  %v167_v24 = vld [vmem:[%s628_s1] sm:$0xff] }
  0x16   : > { %266 = vmatpush.msra.mxu2 %v422_v11  ;;  %435 = vmatpush.msra.mxu3 %v171_v15 }
  0x17   : > { %232 = vmatpush.msra.mxu1 %v410_v13  ;;  %197 = vmatpush.msra.mxu0 %v170_v18 }
  0x18   : > { %267 = vmatpush.msra.mxu2 %v421_v14  ;;  %436 = vmatpush.msra.mxu3 %v170_v18 }
  0x19   : > { %233 = vmatpush.msra.mxu1 %v409_v16  ;;  %198 = vmatpush.msra.mxu0 %v169_v22 }
  0x1a   : > { %268 = vmatpush.msra.mxu2 %v420_v17  ;;  %437 = vmatpush.msra.mxu3 %v169_v22 }
  0x1b   : > { %234 = vmatpush.msra.mxu1 %v408_v19  ;;  %199 = vmatpush.msra.mxu0 %v168_v23 }
  0x1c   : > { %269 = vmatpush.msra.mxu2 %v419_v20  ;;  %416 = vmatmul.msk.f32.vlgmr.msra.gmra.mxu1 %vm175_vm0, %v164_v21 }
  0x1d   : > { %427 = vmatmul.msk.f32.vlgmr.msra.gmra.mxu2 %vm175_vm0, %v164_v21  ;;  %438 = vmatpush.msra.mxu3 %v168_v23 }
  0x1e   : > { %200 = vmatpush.msra.mxu0 %v167_v24 }
  0x1f   : > { %439 = vmatpush.msra.mxu3 %v167_v24  ;;  %405 = vmatmul.msk.f32.vlgmr.msra.gmra.mxu0 %vm175_vm0, %v164_v21 }
  0x20   : > { %406 = vmatmul.msk.f32.vlgmr.msra.gmra.mxu3 %vm175_vm0, %v165_v25 }
  0x24   : > { %417 = vmatmul.msk.f32.gmra.mxu1 %vm175_vm0, %v165_v25 }
  0x25   : > { %428 = vmatmul.msk.f32.gmra.mxu2 %vm175_vm0, %v165_v25 }
  0x28   : > { %407 = vmatmul.msk.f32.gmra.mxu3 %vm175_vm0, %v166_v26 }
  0x2c   : > { %418 = vmatmul.msk.f32.gmra.mxu1 %vm175_vm0, %v166_v26 }
  0x2d   : > { %429 = vmatmul.msk.f32.gmra.mxu2 %vm175_vm0, %v166_v26 }
  0x99   : > { %v236_v27 = vpop.f32.mrf.mxu1 }
  0x9a   : > { %v284_v34 = vrot.slane %v236_v27, 1 }
  0x9c   : > { %v202_v38 = vpop.f32.mrf.mxu0 }
  0xa0   : > { %v271_v28 = vpop.f32.mrf.mxu2 }
  0xa1   : > { %v239_v29 = vpop.f32.mrf.mxu1  ;;  %v297_v37 = vrot.slane %v271_v28, 2 }
  0xa2   : > { %v285_v32 = vrot.slane %v239_v29, 1 }
  0xa3   : > { %v205_v30 = vpop.f32.mrf.mxu3 }
  0xa4   : > { %v286_v39 = vsel %vm283_vm1, %v284_v34, %v285_v32 }
  0xa5   : > { %v291_v43 = vadd.f32 %v286_v39, %v202_v38 }
  0xa8   : > { %v274_v31 = vpop.f32.mrf.mxu2 }
  0xa9   : > { %v242_v33 = vpop.f32.mrf.mxu1  ;;  %v298_v35 = vrot.slane %v274_v31, 2 }
  0xaa   : > { %v287_v36 = vrot.slane %v242_v33, 1 }
  0xab   : > { %v208_v40 = vpop.f32.mrf.mxu3  ;;  %v299_v41 = vsel %vm296_vm2, %v297_v37, %v298_v35 }
  0xac   : > { %v288_v42 = vsel %vm283_vm1, %v285_v32, %v287_v36  ;;  %v304_v46 = vadd.f32 %v299_v41, %v291_v43 }
  0xad   : > { %v292_v47 = vadd.f32 %v288_v42, %v205_v30 }
  0xae   : > { %v313_v50 = vmul.f32 %v304_v46, %v304_v46 }
  0xb0   : > { %v277_v44 = vpop.f32.mrf.mxu2 }
  0xb1   : > { %v300_v45 = vrot.slane %v277_v44, 2 }
  0xb3   : > { %v301_v48 = vsel %vm296_vm2, %v298_v35, %v300_v45 }
  0xb4   : > { %v305_v49 = vadd.f32 %v301_v48, %v292_v47 }
  0xb6   : > { %v306_v51 = vadd.f32 %v305_v49, %v304_v46  ;;  %v314_v52 = vmul.f32 %v305_v49, %v305_v49 }
  0xb8   : > { %v307_v53 = vrot.slane %v306_v51, 4  ;;  %v315_v54 = vadd.f32 %v314_v52, %v313_v50 }
  0xba   : > { %v308_v55 = vadd.f32 %v307_v53, %v306_v51  ;;  %v316_v56 = vrot.slane %v315_v54, 4 }
  0xbc   : > { %v309_v57 = vrot.slane %v308_v55, 2  ;;  %v317_v58 = vadd.f32 %v316_v56, %v315_v54 }
  0xbe   : > { %v310_v59 = vadd.f32 %v309_v57, %v308_v55  ;;  %v318_v60 = vrot.slane %v317_v58, 2 }
  0xc0   : > { %v311_v61 = vrot.slane %v310_v59, 1  ;;  %v319_v62 = vadd.f32 %v318_v60, %v317_v58 }
  0xc2   : > { %v320_v63 = vrot.slane %v319_v62, 1  ;;  %v312_v0 = vadd.f32 %v311_v61, %v310_v59 }
  0xc4   : > { %v321_v1 = vadd.f32 %v320_v63, %v319_v62 }
  0xc6   : > { %v323_v2 = vsel %vm322_vm3, %v312_v0, %v321_v1 }
  0xc7   : > { %324 = vst [vmem:[%s161_s20] sm:$0x3] %v323_v2 }
  0xc8 PF: > { %s12_s11 = sadd.s32 1, %s487_s11   ;;  %s630_s9 = smov %s483_s10 }
  0xc9   : > { %p9_p5 = scmp.ge.s32.totalorder %s12_s11, 4   ;;  %s631_s10 = smov %s633_s12 }
  0xcb   :  { %11 = sbr.rel (!%p9_p5) target bundleno = 2 (0x2), region = 61 }

</bundles_post_ra>
